<compile_context>
chip_gen: v6e
topology: v6e:2x2x1
jax: 0.10.0
libtpu: 0.0.40
codegen_flags: <defaults>
</compile_context>

<pallas_src>
import functools

import jax
import jax.numpy as jnp
from jax.experimental import pallas as pl
from jax.experimental.pallas import tpu as pltpu


def _transpose_tile_kernel(x_ref, o_ref):
    # One (T_last, T_pen) input tile -> (T_pen, T_last) output tile (XLU vxpose).
    o_ref[...] = x_ref[...].T


def _copy_tile_kernel(x_ref, o_ref):
    # Leading-axis-only permutation: the BlockSpec index remap does all the
    # work; the kernel is a straight tile copy.
    o_ref[...] = x_ref[...]


def _full_permute_kernel(x_ref, o_ref, *, perm):
    o_ref[...] = jnp.transpose(x_ref[...], perm)


def _pick_tile(dim: int) -> int:
    """Largest aligned tile (512/256/128) dividing `dim`, else the full dim."""
    for t in (512, 256, 128):
        if t <= dim and dim % t == 0:
            return t
    return dim  # full extent is always a legal block size


class Permute:
    """Pallas equivalent of the PyTorch `Permute` nn.Module."""

    def __init__(self, *args):
        self.args = tuple(int(a) for a in args)

    def __call__(self, x: jax.Array) -> jax.Array:
        perm = self.args
        assert len(perm) == x.ndim, "permutation rank must match input rank"
        ndim = x.ndim
        out_shape = tuple(x.shape[p] for p in perm)

        if perm == tuple(range(ndim)):
            return x  # identity permutation

        # Fast tiled path: last two input axes stay in the last two output
        # positions (possibly swapped); leading axes permute among themselves.
        # Covers Mamba's Permute(0, 2, 1).
        if ndim >= 2 and set(perm[-2:]) == {ndim - 2, ndim - 1}:
            n_lead = ndim - 2
            swapped = perm[-2:] == (ndim - 1, ndim - 2)

            t_pen = _pick_tile(out_shape[-2])
            t_last = _pick_tile(out_shape[-1])

            grid = tuple(out_shape[:n_lead]) + (
                out_shape[-2] // t_pen,
                out_shape[-1] // t_last,
            )

            lead_block = tuple(pl.Squeezed() for _ in range(n_lead))
            out_block = lead_block + (t_pen, t_last)
            in_block = lead_block + ((t_last, t_pen) if swapped else (t_pen, t_last))

            # Input leading axis `a` is driven by grid axis perm.index(a).
            lead_src = tuple(perm.index(a) for a in range(n_lead))

            def in_index_map(*idxs):
                lead = tuple(idxs[s] for s in lead_src)
                i, j = idxs[n_lead], idxs[n_lead + 1]
                return lead + ((j, i) if swapped else (i, j))

            def out_index_map(*idxs):
                return idxs

            kernel = _transpose_tile_kernel if swapped else _copy_tile_kernel
            return pl.pallas_call(
                kernel,
                out_shape=jax.ShapeDtypeStruct(out_shape, x.dtype),
                grid=grid,
                in_specs=[pl.BlockSpec(in_block, in_index_map)],
                out_specs=pl.BlockSpec(out_block, out_index_map),
                compiler_params=pltpu.CompilerParams(
                    dimension_semantics=("parallel",) * len(grid)
                ),
            )(x)

        # TODO(synk): tile permutations that move the trailing input axes into
        # leading output positions; for now a single program holds the whole
        # array in VMEM (valid only for small arrays).
        kernel = functools.partial(_full_permute_kernel, perm=perm)
        return pl.pallas_call(
            kernel,
            out_shape=jax.ShapeDtypeStruct(out_shape, x.dtype),
            in_specs=[pl.BlockSpec(x.shape, lambda *_: (0,) * ndim)],
            out_specs=pl.BlockSpec(out_shape, lambda *_: (0,) * ndim),
        )(x)


if __name__ == "__main__":
    key = jax.random.PRNGKey(0)
    k1, k2, k3 = jax.random.split(key, 3)

    # 1) Canonical Mamba use: (B, L, D) -> (B, D, L), small shape.
    x1 = jax.random.normal(k1, (2, 8, 128), dtype=jnp.float32)
    y1 = jax.block_until_ready(Permute(0, 2, 1)(x1))
    r1 = jnp.transpose(x1, (0, 2, 1))
    assert y1.shape == r1.shape and y1.dtype == r1.dtype
    assert bool(jnp.array_equal(y1, r1))

    # 2) Same permutation at a shape that exercises a real multi-tile grid
    #    (grid = (2, 3, 5) with 128x128 tiles).
    x2 = jax.random.normal(k2, (2, 640, 384), dtype=jnp.float32)
    y2 = jax.block_until_ready(Permute(0, 2, 1)(x2))
    r2 = jnp.transpose(x2, (0, 2, 1))
    assert y2.shape == r2.shape and bool(jnp.array_equal(y2, r2))

    # 3) 4-D case: leading-axis permutation combined with a trailing swap.
    x3 = jax.random.normal(k3, (2, 3, 16, 128), dtype=jnp.float32)
    y3 = jax.block_until_ready(Permute(1, 0, 3, 2)(x3))
    r3 = jnp.transpose(x3, (1, 0, 3, 2))
    assert y3.shape == r3.shape and bool(jnp.array_equal(y3, r3))

    print("KERNEL_OK")
</pallas_src>

<mosaic_0001>
module attributes {stable_mosaic.version = 11 : i64} {
  func.func @_transpose_tile_kernel(%arg0: i32, %arg1: i32, %arg2: i32, %arg3: memref<1x8x128xf32, #tpu.memory_space<vmem>>, %arg4: memref<1x128x8xf32, #tpu.memory_space<vmem>>) attributes {dimension_semantics = [#tpu.dimension_semantics<parallel>, #tpu.dimension_semantics<parallel>, #tpu.dimension_semantics<parallel>], iteration_bounds = array<i64: 2, 1, 1>, scalar_prefetch = 0 : i64, scratch_operands = 0 : i64, tpu.core_type = #tpu.core_type<tc>, window_params = [{transform_indices = @transform_0, window_bounds = array<i64: 1, 8, 128>}, {transform_indices = @transform_1, window_bounds = array<i64: 1, 128, 8>}]} {
    %c0 = arith.constant 0 : index
    %c0_0 = arith.constant 0 : index
    %c0_1 = arith.constant 0 : index
    %0 = vector.load %arg3[%c0, %c0_0, %c0_1] : memref<1x8x128xf32, #tpu.memory_space<vmem>>, vector<1x8x128xf32>
    %1 = vector.shape_cast %0 : vector<1x8x128xf32> to vector<8x128xf32>
    %2 = tpu.transpose %1, [1, 0] : vector<8x128xf32> -> vector<128x8xf32>
    %c0_2 = arith.constant 0 : index
    %c0_3 = arith.constant 0 : index
    %c0_4 = arith.constant 0 : index
    %3 = vector.load %arg4[%c0_2, %c0_3, %c0_4] : memref<1x128x8xf32, #tpu.memory_space<vmem>>, vector<1x128x8xf32>
    %4 = vector.shape_cast %3 : vector<1x128x8xf32> to vector<128x8xf32>
    %5 = vector.shape_cast %2 : vector<128x8xf32> to vector<1x128x8xf32>
    tpu.vector_store %arg4[%c0_2, %c0_3, %c0_4], %5 {strides = array<i32>} : memref<1x128x8xf32, #tpu.memory_space<vmem>>, vector<1x128x8xf32>,
    return
  }
  func.func @transform_0(%arg0: i32, %arg1: i32, %arg2: i32) -> (i32, i32, i32) {
    %c0_i32 = arith.constant 0 : i32
    return %arg0, %arg2, %arg1 : i32, i32, i32
  }
  func.func @transform_1(%arg0: i32, %arg1: i32, %arg2: i32) -> (i32, i32, i32) {
    %c0_i32 = arith.constant 0 : i32
    return %arg0, %arg1, %arg2 : i32, i32, i32
  }
}

</mosaic_0001>

<bundles_post_ra>
// kernel: tpu_custom_call.1
= control target key start
LH: loop header
LB: loop body
LE: loop exit
PB: predicated region body
PF: predicated region fallthrough
CT: control target
= control target key end

     0   :  { %6 = vsyncpa [#allocation3], 0  ;;  %s629_s0 = inlined_call_operand.hbm [shape: f32[2,8,128], index: 0, kind: input, shape index: {}]   ;;  %s630_s1 = inlined_call_operand.vmem [shape: f32[2,128,8], index: 1, kind: output, shape index: {}]  }
   0x1   :  { %8 = vsyncpa [#allocation3 + $0x1], 0  ;;  %s495_s6 = smov 0   ;;  %s497_s7 = smov 0  }
   0x2   :  { %s499_s8 = smov 0   ;;  %s501_s9 = smov 0  }
   0x3   :  { %s503_s10 = smov 0   ;;  %s505_s11 = smov 0  }
   0x4 LB: > { %s335_s12 = sadd.s32 4294967295, %s482_s11   ;;  %s33_s13 = sadd.s32 1, %s478_s10  ;;  %s482_s11 = sphi %s505_s11, %s14_s11   ;;  %s478_s10 = sphi %s503_s10, %s638_s10   ;;  %s474_s9 = sphi %s501_s9, %s637_s9   ;;  %s470_s8 = sphi %s499_s8, %s636_s8   ;;  %s466_s7 = sphi %s497_s7, %s635_s7   ;;  %s462_s6 = sphi %s495_s6, %s634_s6  }
   0x5   : > { %p35_p0 = scmp.ge.s32.totalorder %s33_s13, 2  ;;  %s44_s14 = sadd.s32 1, %s470_s8 }
   0x6   : > { %p51_p1 = scmp.ne.s32.totalorder %s470_s8, %s466_s7  ;;  %p52_p2 = scmp.eq.s32.totalorder %s482_s11, 0 }
   0x7   : > { %s640_s13 = smov (%p35_p0, %s33_s13), 0  ;;  %p57_p4 = scmp.ne.s32.totalorder %s466_s7, %s462_s6 }
   0x8   : > { %p531_p3 = por %p52_p2, %p51_p1  ;;  %s37_s16 = ssub.s32 %s478_s10, %s640_s13 }
   0x9   : > { %p58_p5 = scmp.eq.s32.totalorder %s335_s12, 0  ;;  %p42_p6 = scmp.eq.s32.totalorder %s37_s16, 0 }
   0xa   : > { %p354_p8 = scmp.lt.s32.totalorder %s482_s11, 2  ;;  %s111_s19 = sand.u32 1, %s470_s8  }
   0xb   : > { %p538_p7 = por %p58_p5, %p57_p4  ;;  %s340_s20 = sshll.u32 %s478_s10, 7 }
   0xc   : > { %s544_s18 = scalar_select %p42_p6, %s470_s8, %s44_s14  }
   0xd   : > { %s339_s21 = sshll.u32 %s111_s19, 3  ;;  %s122_s24 = scalar_lea.hbm %s629_s0, %s340_s20 }
   0xe   : > { %s115_s25 = scalar_lea.vmem [#allocation2], %s339_s21  ;;  %p553_p9 = pnand %p354_p8, %p531_p3 }
   0xf   : > { %s124_s26 = sshll.u32 %s115_s25, 4  ;;  %p341_p10 = scmp.ge.s32.totalorder %s482_s11, 1  ;;  %s125_s26 = int_to_ptr.vmem [resolvable:$true] %s124_s26 }
  0x10   : > { %p129_p11 = scmp.lt.s32.totalorder %s482_s11, 3  ;;  %s112_s28 = scalar_lea.sflag [#allocation3], %s111_s19 }
  0x11   : > { %p406_p12 = pneg %p553_p9  ;;  %s417_s29 = scalar_lea.vmem %s125_s26, 128 }
  0x12   : > { %p418_p13 = scmp.ne.s32.totalorder %s125_s26, %s417_s29  ;;  %s484_s30 = smov [#allocation2]  }
  0x13   : > { %s422_s2 = sshll.u32 %s484_s30, 4  ;;  %s423_s2 = int_to_ptr.vmem [resolvable:$false] %s422_s2 }
  0x14   : > { %p420_p0 = pnand %p418_p13, %p406_p12  ;;  %s424_s3 = scalar_lea.vmem %s423_s2, 256 }
  0x15   : > { %p425_p2 = scmp.lt.s32.totalorder %s125_s26, %s423_s2  ;;  %p426_p3 = scmp.lt.s32.totalorder %s424_s3, %s417_s29 }
  0x16   : > { %p421_p1 = pneg %p420_p0 }
  0x17   : > { %p427_p4 = por %p426_p3, %p425_p2 }
  0x19   : > { %p428_p5 = pnand %p427_p4, %p421_p1 }
  0x1b   : > { %431 = shalt.err (!%p428_p5)
}
  0x1c   : > { %353 = dma.hbm_to_vmem [thread:$0]  (!%p553_p9), %s122_s24, 128, %s125_s26, %s112_s28  }
  0x1d   : > { %p130_p6 = pnand %p341_p10, %p129_p11 }
  0x1e   : > { %s135_s4 = sand.u32 (!%p130_p6), 1, %s466_s7  }
  0x1f   : > { %133 = sbr.rel (%p130_p6) target bundleno = 224 (0xe0), region = 24  ;;  %s342_s5 = sshll.u32 (!%p130_p6), %s135_s4, 3 }
  0x20   : > { %s136_s6 = scalar_lea.sflag (!%p130_p6), [#allocation3], %s135_s4  ;;  %s139_s12 = scalar_lea.vmem (!%p130_p6), [#allocation2], %s342_s5 }
  0x24   : > { %457 = dma.done.wait (%p538_p7), %s136_s6, 128  }
  0x25   : > { %459 = vsyncadd (%p538_p7), %s136_s6, 4294967168  ;;  %v178_v0 = vld [vmem:[%s139_s12] sm:$0xff]  ;;  %p166_p8 = scmp.lt.s32.totalorder %s474_s9, 1  ;;  %vm211_vm0 = vcmask 64512  }
  0x26   : > { %179 = vxpose.xlu0.b32.start.end [1/1] (short) %v178_v0, 128 }
  0x27   : > { %s642_s9 = smov (!%p166_p8, %s474_s9), 1 }
  0x28   : > { %s347_s14 = sshll.u32 %s642_s9, 7 }
  0x29   : > { %s577_s19 = scalar_lea.vmem %s630_s1, %s347_s14 }
  0xa2   : > { %v195_v1 = vpop.trf.xlu0 }
  0xa3   : > { %212 = vst.msk [vmem:[%s577_s19] sm:$0xff] %vm211_vm0, %v195_v1 }
  0xa6   : > { %v196_v2 = vpop.trf.xlu0 }
  0xa7   : > { %213 = vst.msk [vmem:[%s577_s19 + $0x8] sm:$0xff] %vm211_vm0, %v196_v2 }
  0xaa   : > { %v197_v3 = vpop.trf.xlu0 }
  0xab   : > { %214 = vst.msk [vmem:[%s577_s19 + $0x10] sm:$0xff] %vm211_vm0, %v197_v3 }
  0xae   : > { %v198_v4 = vpop.trf.xlu0 }
  0xaf   : > { %215 = vst.msk [vmem:[%s577_s19 + $0x18] sm:$0xff] %vm211_vm0, %v198_v4 }
  0xb2   : > { %v199_v5 = vpop.trf.xlu0 }
  0xb3   : > { %216 = vst.msk [vmem:[%s577_s19 + $0x20] sm:$0xff] %vm211_vm0, %v199_v5 }
  0xb6   : > { %v200_v6 = vpop.trf.xlu0 }
  0xb7   : > { %217 = vst.msk [vmem:[%s577_s19 + $0x28] sm:$0xff] %vm211_vm0, %v200_v6 }
  0xba   : > { %v201_v7 = vpop.trf.xlu0 }
  0xbb   : > { %218 = vst.msk [vmem:[%s577_s19 + $0x30] sm:$0xff] %vm211_vm0, %v201_v7 }
  0xbe   : > { %v202_v8 = vpop.trf.xlu0 }
  0xbf   : > { %219 = vst.msk [vmem:[%s577_s19 + $0x38] sm:$0xff] %vm211_vm0, %v202_v8 }
  0xc2   : > { %v203_v9 = vpop.trf.xlu0 }
  0xc3   : > { %220 = vst.msk [vmem:[%s577_s19 + $0x40] sm:$0xff] %vm211_vm0, %v203_v9 }
  0xc6   : > { %v204_v10 = vpop.trf.xlu0 }
  0xc7   : > { %221 = vst.msk [vmem:[%s577_s19 + $0x48] sm:$0xff] %vm211_vm0, %v204_v10 }
  0xca   : > { %v205_v11 = vpop.trf.xlu0 }
  0xcb   : > { %222 = vst.msk [vmem:[%s577_s19 + $0x50] sm:$0xff] %vm211_vm0, %v205_v11 }
  0xce   : > { %v206_v12 = vpop.trf.xlu0 }
  0xcf   : > { %223 = vst.msk [vmem:[%s577_s19 + $0x58] sm:$0xff] %vm211_vm0, %v206_v12 }
  0xd2   : > { %v207_v13 = vpop.trf.xlu0 }
  0xd3   : > { %224 = vst.msk [vmem:[%s577_s19 + $0x60] sm:$0xff] %vm211_vm0, %v207_v13 }
  0xd6   : > { %v208_v14 = vpop.trf.xlu0 }
  0xd7   : > { %225 = vst.msk [vmem:[%s577_s19 + $0x68] sm:$0xff] %vm211_vm0, %v208_v14 }
  0xda   : > { %v209_v15 = vpop.trf.xlu0 }
  0xdb   : > { %226 = vst.msk [vmem:[%s577_s19 + $0x70] sm:$0xff] %vm211_vm0, %v209_v15 }
  0xde   : > { %v210_v16 = vpop.trf.xlu0 }
  0xdf   : > { %227 = vst.msk [vmem:[%s577_s19 + $0x78] sm:$0xff] %vm211_vm0, %v210_v16 }
  0xe0 PF: > { %s14_s11 = sadd.s32 1, %s482_s11   ;;  %s634_s6 = smov %s466_s7 }
  0xe1   : > { %p11_p7 = scmp.ge.s32.totalorder %s14_s11, 4   ;;  %s635_s7 = smov %s470_s8 }
  0xe2   : > { %s636_s8 = smov %s544_s18  ;;  %s637_s9 = smov %s478_s10 }
  0xe3   : > { %s638_s10 = smov %s640_s13  ;;  %13 = sbr.rel (!%p11_p7) target bundleno = 4 (0x4), region = 64 }
  0xe8   :  { %264 = vsyncpa [#allocation3], 1 }
  0xe9   :  { %266 = vsyncpa [#allocation3 + $0x1], 1 }

</bundles_post_ra>
